<compile_context>
chip_gen: v6e
topology: v6e:2x2x1
jax: 0.10.0
libtpu: 0.0.40
codegen_flags: <defaults>
</compile_context>

<pallas_src>
import functools

import jax
import jax.numpy as jnp
from jax.experimental import pallas as pl
from jax.experimental.pallas import tpu as pltpu

LANE = 128  # TPU vreg lane width; fc2's action axis is padded to this.


def policy_net_kernel(x_ref, w1b_ref, w2b_ref, out_ref):
    """softmax(relu(x @ w1 + b1) @ w2 + b2) on one VMEM-resident tile.

    x_ref   : (TB, S)        f32
    w1b_ref : (S + 1, H)     f32   rows 0..S-1 = w1, row S = b1
    w2b_ref : (H + 1, LANE)  f32   rows 0..H-1 = w2 (zero-padded cols),
                                   row H = b2 (-1e30 in padded cols)
    out_ref : (TB, LANE)     f32   probs; padded action columns are exactly 0
    """
    s = w1b_ref.shape[0] - 1    # state_dim  (static)
    hd = w2b_ref.shape[0] - 1   # hidden_dim (static)

    # fc1 + ReLU: (TB,S) @ (S,H) + (1,H)
    h = jnp.dot(x_ref[...], w1b_ref[:s, :], preferred_element_type=jnp.float32)
    h = jnp.maximum(h + w1b_ref[s:s + 1, :], 0.0)

    # fc2: (TB,H) @ (H,LANE) + (1,LANE). Padded action columns have zero weights
    # and a -1e30 bias, so exp(logit - max) underflows to exactly 0 there.
    logits = jnp.dot(h, w2b_ref[:hd, :], preferred_element_type=jnp.float32)
    logits = logits + w2b_ref[hd:hd + 1, :]

    # Numerically-stable softmax over the (padded) action axis.
    m = jnp.max(logits, axis=1, keepdims=True)
    e = jnp.exp(logits - m)
    denom = jnp.sum(e, axis=1, keepdims=True)
    out_ref[...] = e * pl.reciprocal(denom, approx=True)


def pack_params(w1, b1, w2, b2, lane=LANE):
    """One-time fold of biases into the weight matrices + lane-pad the action axis."""
    s, h = w1.shape
    h2, a = w2.shape
    assert h2 == h and a <= lane
    w1b = jnp.concatenate([w1, b1.reshape(1, h)], axis=0).astype(jnp.float32)
    w2_pad = jnp.zeros((h, lane), jnp.float32).at[:, :a].set(w2)
    b2_pad = jnp.full((1, lane), -1e30, jnp.float32).at[:, :a].set(b2.reshape(1, a))
    w2b = jnp.concatenate([w2_pad, b2_pad], axis=0)
    return w1b, w2b


@functools.partial(jax.jit, static_argnames=("action_dim", "batch_block"))
def policy_net_forward(x, w1b, w2b, *, action_dim, batch_block=512):
    """Full PolicyNet forward. Returns (B, action_dim) probabilities (rows sum to 1)."""
    b, s = x.shape
    lane = w2b.shape[1]

    if b <= batch_block:
        # Tiny batch: single shot, whole arrays resident in VMEM, no grid,
        # no pipeline double-buffering / per-step bookkeeping.
        probs = pl.pallas_call(
            policy_net_kernel,
            out_shape=jax.ShapeDtypeStruct((b, lane), jnp.float32),
            in_specs=[pl.BlockSpec(memory_space=pltpu.MemorySpace.VMEM)] * 3,
            out_specs=pl.BlockSpec(memory_space=pltpu.MemorySpace.VMEM),
        )(x, w1b, w2b)
    else:
        # Big batch (e.g. PPO update over many env steps): tile the batch axis.
        nb = pl.cdiv(b, batch_block)
        b_pad = nb * batch_block
        x_in = x if b_pad == b else jnp.pad(x, ((0, b_pad - b), (0, 0)))
        probs = pl.pallas_call(
            policy_net_kernel,
            out_shape=jax.ShapeDtypeStruct((b_pad, lane), jnp.float32),
            grid=(nb,),
            in_specs=[
                pl.BlockSpec((batch_block, s), lambda i: (i, 0)),
                pl.BlockSpec(w1b.shape, lambda i: (0, 0)),
                pl.BlockSpec(w2b.shape, lambda i: (0, 0)),
            ],
            out_specs=pl.BlockSpec((batch_block, lane), lambda i: (i, 0)),
            compiler_params=pltpu.CompilerParams(
                dimension_semantics=("parallel",)),
        )(x_in, w1b, w2b)
        probs = probs[:b]

    return probs[:, :action_dim]


def init_params(key, state_dim, hidden_dim, action_dim):
    """Deterministic init mimicking torch.nn.Linear default (uniform +/- 1/sqrt(fan_in))."""
    k1, k2, k3, k4 = jax.random.split(key, 4)
    bound1 = 1.0 / jnp.sqrt(state_dim)
    bound2 = 1.0 / jnp.sqrt(hidden_dim)
    w1 = jax.random.uniform(k1, (state_dim, hidden_dim), jnp.float32, -bound1, bound1)
    b1 = jax.random.uniform(k2, (1, hidden_dim), jnp.float32, -bound1, bound1)
    w2 = jax.random.uniform(k3, (hidden_dim, action_dim), jnp.float32, -bound2, bound2)
    b2 = jax.random.uniform(k4, (1, action_dim), jnp.float32, -bound2, bound2)
    return w1, b1, w2, b2


if __name__ == "__main__":
    # CartPole-v1: state_dim=4, action_dim=2, hidden_dim=128.
    STATE_DIM, HIDDEN_DIM, ACTION_DIM = 4, 128, 2

    key = jax.random.PRNGKey(0)
    kx, kp, kb = jax.random.split(key, 3)
    w1, b1, w2, b2 = init_params(kp, STATE_DIM, HIDDEN_DIM, ACTION_DIM)
    w1b, w2b = pack_params(w1, b1, w2, b2)   # one-time param packing

    def reference(xx):  # pure-JAX reference, same math
        h_ref = jnp.maximum(xx @ w1 + b1, 0.0)
        return jax.nn.softmax(h_ref @ w2 + b2, axis=1)

    # 1) Rollout-sized batch -> grid-less single-shot path.
    x_small = jax.random.normal(kx, (8, STATE_DIM), dtype=jnp.float32)
    p_small = jax.block_until_ready(
        policy_net_forward(x_small, w1b, w2b, action_dim=ACTION_DIM))
    assert p_small.shape == (8, ACTION_DIM)
    assert jnp.allclose(p_small, reference(x_small), atol=5e-3), "small-batch mismatch"
    assert jnp.allclose(jnp.sum(p_small, axis=1), 1.0, atol=5e-3)

    # 2) PPO-update-sized batch -> parallel 1-D grid over batch tiles (with padding).
    x_big = jax.random.normal(kb, (1000, STATE_DIM), dtype=jnp.float32)
    p_big = jax.block_until_ready(
        policy_net_forward(x_big, w1b, w2b, action_dim=ACTION_DIM))
    assert p_big.shape == (1000, ACTION_DIM)
    assert jnp.allclose(p_big, reference(x_big), atol=5e-3), "big-batch mismatch"
    assert jnp.allclose(jnp.sum(p_big, axis=1), 1.0, atol=5e-3)

    print("KERNEL_OK")
</pallas_src>

<mosaic_0001>
module attributes {stable_mosaic.version = 11 : i64} {
  func.func @policy_net_kernel(%arg0: memref<8x4xf32, #tpu.memory_space<vmem>>, %arg1: memref<5x128xf32, #tpu.memory_space<vmem>>, %arg2: memref<129x128xf32, #tpu.memory_space<vmem>>, %arg3: memref<8x128xf32, #tpu.memory_space<vmem>>) attributes {dimension_semantics = [], scalar_prefetch = 0 : i64, scratch_operands = 0 : i64, tpu.core_type = #tpu.core_type<tc>} {
    %c0 = arith.constant 0 : index
    %c0_0 = arith.constant 0 : index
    %0 = vector.load %arg0[%c0, %c0_0] : memref<8x4xf32, #tpu.memory_space<vmem>>, vector<8x4xf32>
    %c0_1 = arith.constant 0 : index
    %c0_2 = arith.constant 0 : index
    %1 = vector.load %arg1[%c0_1, %c0_2] : memref<5x128xf32, #tpu.memory_space<vmem>>, vector<4x128xf32>
    %cst = arith.constant dense<0.000000e+00> : vector<8x128xf32>
    %2 = tpu.matmul %0, %1, %cst {dimension_numbers = #tpu.dot_dimension_numbers<[1], [0], [0], [1], [0, 0, 1, 1], [], []>} : vector<8x4xf32>, vector<4x128xf32>, vector<8x128xf32> -> vector<8x128xf32>
    %c4 = arith.constant 4 : index
    %c0_3 = arith.constant 0 : index
    %3 = vector.load %arg1[%c4, %c0_3] : memref<5x128xf32, #tpu.memory_space<vmem>>, vector<1x128xf32>
    %4 = vector.broadcast %3 : vector<1x128xf32> to vector<8x128xf32>
    %5 = arith.addf %2, %4 : vector<8x128xf32>
    %cst_4 = arith.constant 0.000000e+00 : f32
    %6 = vector.broadcast %cst_4 : f32 to vector<8x128xf32>
    %7 = arith.maximumf %5, %6 : vector<8x128xf32>
    %c0_5 = arith.constant 0 : index
    %c0_6 = arith.constant 0 : index
    %8 = vector.load %arg2[%c0_5, %c0_6] : memref<129x128xf32, #tpu.memory_space<vmem>>, vector<128x128xf32>
    %cst_7 = arith.constant dense<0.000000e+00> : vector<8x128xf32>
    %9 = tpu.matmul %7, %8, %cst_7 {dimension_numbers = #tpu.dot_dimension_numbers<[1], [0], [0], [1], [0, 0, 1, 1], [], []>} : vector<8x128xf32>, vector<128x128xf32>, vector<8x128xf32> -> vector<8x128xf32>
    %c128 = arith.constant 128 : index
    %c0_8 = arith.constant 0 : index
    %10 = vector.load %arg2[%c128, %c0_8] : memref<129x128xf32, #tpu.memory_space<vmem>>, vector<1x128xf32>
    %11 = vector.broadcast %10 : vector<1x128xf32> to vector<8x128xf32>
    %12 = arith.addf %9, %11 : vector<8x128xf32>
    %cst_9 = arith.constant dense<0xFF800000> : vector<8xf32>
    %13 = vector.multi_reduction <maximumf>, %12, %cst_9 [1] : vector<8x128xf32> to vector<8xf32>
    %14 = vector.shape_cast %13 : vector<8xf32> to vector<8x1xf32>
    %15 = vector.broadcast %14 : vector<8x1xf32> to vector<8x128xf32>
    %16 = arith.subf %12, %15 : vector<8x128xf32>
    %17 = math.exp %16 : vector<8x128xf32>
    %cst_10 = arith.constant dense<0.000000e+00> : vector<8xf32>
    %18 = vector.multi_reduction <add>, %17, %cst_10 [1] : vector<8x128xf32> to vector<8xf32>
    %19 = vector.shape_cast %18 : vector<8xf32> to vector<8x1xf32>
    %20 = tpu.reciprocal %19 {approx = true} : vector<8x1xf32> -> vector<8x1xf32>
    %21 = vector.broadcast %20 : vector<8x1xf32> to vector<8x128xf32>
    %22 = arith.mulf %17, %21 : vector<8x128xf32>
    %c0_11 = arith.constant 0 : index
    %c0_12 = arith.constant 0 : index
    %23 = vector.load %arg3[%c0_11, %c0_12] : memref<8x128xf32, #tpu.memory_space<vmem>>, vector<8x128xf32>
    tpu.vector_store %arg3[%c0_11, %c0_12], %22 {strides = array<i32>} : memref<8x128xf32, #tpu.memory_space<vmem>>, vector<8x128xf32>,
    return
  }
}

</mosaic_0001>

<bundles_post_ra>
// kernel: policy_net_forward.1
= control target key start
LH: loop header
LB: loop body
LE: loop exit
PB: predicated region body
PF: predicated region fallthrough
CT: control target
= control target key end

     0   :  { %8 = vsyncpa [#allocation3], 0  ;;  %s314_s12 = smov [#allocation2]   ;;  %s354_s0 = inlined_call_operand.vmem [shape: f32[8,4], index: 0, kind: input, shape index: {}]   ;;  %s355_s1 = inlined_call_operand.vmem [shape: f32[5,128], index: 1, kind: input, shape index: {}]   ;;  %s356_s2 = inlined_call_operand.hbm [shape: f32[129,128], index: 2, kind: input, shape index: {}]   ;;  %s357_s3 = inlined_call_operand.vmem [shape: f32[8,128], index: 3, kind: output, shape index: {}]  }
   0x1   :  { %s18_s13 = sshll.u32 %s314_s12, 4  ;;  %s19_s13 = int_to_ptr.vmem [resolvable:$true] %s18_s13 }
   0x2   :  { %s300_s14 = scalar_lea.vmem %s19_s13, 2176  ;;  %p305_p1 = scmp.lt.s32.totalorder %s19_s13, %s19_s13 }
   0x3   :  { %p301_p0 = scmp.ne.s32.totalorder %s19_s13, %s300_s14  ;;  %p306_p2 = scmp.lt.s32.totalorder %s300_s14, %s300_s14 }
   0x5   :  { %p307_p3 = por %p306_p2, %p305_p1 }
   0x7   :  { %p308_p4 = pnand %p307_p3, %p301_p0 }
   0x9   :  { %311 = shalt.err (!%p308_p4)
}
   0xa   :  { %s315_s15 = smov 128   ;;  %s316_s16 = smov 8  }
   0xb   :  { %24 = dma.hbm_to_vmem [thread:$0]  %s356_s2, 2176, %s19_s13, [#allocation3], %s315_s15, %s315_s15, %s316_s16  }
   0xc   :  { %312 = dma.done.wait [#allocation3], 2176  }
   0xd   :  { %313 = vsyncadd [#allocation3], 4294965120  ;;  %v317_v0 = vmov 0.0   ;;  %vm318_vm0 = vmmov 0   ;;  %vm39_vm1 = vcmask 1043456   ;;  %vm35_vm2 = vcmask 31744  }
   0xe   :  { %243 = vmatprep.subr.mxu0 %v317_v0  ;;  %245 = vmatprep.mubr.msk.f32.mxu0 %vm318_vm0, %v317_v0  ;;  %v29_v1 = vld [vmem:[%s355_s1] sm:$0xf]  ;;  %v129_v3 = vld [vmem:[#allocation2 + $0x78] sm:$0xff]  ;;  %v128_v4 = vld [vmem:[#allocation2 + $0x70] sm:$0xff] }
   0xf   :  { %248 = vmatprep.subr.mxu1 %v317_v0  ;;  %280 = vmatprep.mubr.msk.f32.mxu1 %vm318_vm0, %v317_v0  ;;  %v28_v2 = vld [vmem:[%s354_s0] sm:$0xff]  ;;  %v127_v5 = vld [vmem:[#allocation2 + $0x68] sm:$0xff]  ;;  %v125_v7 = vld [vmem:[#allocation2 + $0x58] sm:$0xff] }
  0x10   :  { %244 = vmatpush3.msk.msra.mxu0 %vm39_vm1, %v29_v1  ;;  %249 = vmatpush3.msra.mxu1 %v129_v3  ;;  %v126_v6 = vld [vmem:[#allocation2 + $0x60] sm:$0xff]  ;;  %v124_v8 = vld [vmem:[#allocation2 + $0x50] sm:$0xff]  ;;  %v123_v9 = vld [vmem:[#allocation2 + $0x48] sm:$0xff] }
  0x11   :  { %246 = vmatmul.mubr.msk.f32.vlgmr.msra.gmra.mxu0 %vm35_vm2, %v28_v2  ;;  %250 = vmatprep.subr.mxu1 %v317_v0  ;;  %v122_v10 = vld [vmem:[#allocation2 + $0x40] sm:$0xff]  ;;  %v121_v11 = vld [vmem:[#allocation2 + $0x38] sm:$0xff]  ;;  %v120_v12 = vld [vmem:[#allocation2 + $0x30] sm:$0xff] }
  0x12   :  { %251 = vmatpush3.msra.mxu1 %v128_v4  ;;  %v119_v13 = vld [vmem:[#allocation2 + $0x28] sm:$0xff]  ;;  %v118_v14 = vld [vmem:[#allocation2 + $0x20] sm:$0xff]  ;;  %v117_v15 = vld [vmem:[#allocation2 + $0x18] sm:$0xff] }
  0x13   :  { %252 = vmatprep.subr.mxu1 %v317_v0  ;;  %v116_v16 = vld [vmem:[#allocation2 + $0x10] sm:$0xff]  ;;  %v115_v17 = vld [vmem:[#allocation2 + $0x8] sm:$0xff]  ;;  %v114_v18 = vld [vmem:[#allocation2] sm:$0xff] }
  0x14   :  { %253 = vmatpush3.msra.mxu1 %v127_v5  ;;  %v220_v19 = vld [vmem:[%s355_s1 + $0x4] ss:$0 sm:$0xff]  ;;  %v223_v24 = vld [vmem:[#allocation2 + $0x80] ss:$0 sm:$0xff] }
  0x15   :  { %254 = vmatprep.subr.mxu1 %v317_v0 }
  0x16   :  { %255 = vmatpush3.msra.mxu1 %v126_v6 }
  0x17   :  { %256 = vmatprep.subr.mxu1 %v317_v0 }
  0x18   :  { %257 = vmatpush3.msra.mxu1 %v125_v7 }
  0x19   :  { %258 = vmatprep.subr.mxu1 %v317_v0 }
  0x1a   :  { %259 = vmatpush3.msra.mxu1 %v124_v8 }
  0x1b   :  { %260 = vmatprep.subr.mxu1 %v317_v0 }
  0x1c   :  { %261 = vmatpush3.msra.mxu1 %v123_v9 }
  0x1d   :  { %262 = vmatprep.subr.mxu1 %v317_v0 }
  0x1e   :  { %263 = vmatpush3.msra.mxu1 %v122_v10 }
  0x1f   :  { %264 = vmatprep.subr.mxu1 %v317_v0 }
  0x20   :  { %265 = vmatpush3.msra.mxu1 %v121_v11 }
  0x21   :  { %266 = vmatprep.subr.mxu1 %v317_v0 }
  0x22   :  { %267 = vmatpush3.msra.mxu1 %v120_v12 }
  0x23   :  { %268 = vmatprep.subr.mxu1 %v317_v0 }
  0x24   :  { %269 = vmatpush3.msra.mxu1 %v119_v13 }
  0x25   :  { %270 = vmatprep.subr.mxu1 %v317_v0 }
  0x26   :  { %271 = vmatpush3.msra.mxu1 %v118_v14 }
  0x27   :  { %272 = vmatprep.subr.mxu1 %v317_v0 }
  0x28   :  { %273 = vmatpush3.msra.mxu1 %v117_v15 }
  0x29   :  { %274 = vmatprep.subr.mxu1 %v317_v0 }
  0x2a   :  { %275 = vmatpush3.msra.mxu1 %v116_v16 }
  0x2b   :  { %276 = vmatprep.subr.mxu1 %v317_v0 }
  0x2c   :  { %277 = vmatpush3.msra.mxu1 %v115_v17 }
  0x2d   :  { %278 = vmatprep.subr.mxu1 %v317_v0 }
  0x2e   :  { %279 = vmatpush3.msra.mxu1 %v114_v18 }
  0xd1   :  { %v109_v20 = vpop.f32.mrf.mxu0 }
  0xd2   :  { %v110_v21 = vadd.f32 %v220_v19, %v109_v20 }
  0xd3   :  { %v247_v22 = vpop.f32.mrf.mxu0 }
  0xd4   :  { %v113_v23 = vmax.f32 %v110_v21, 0.0 }
  0xd6   :  { %281 = vmatmul.mubr.f32.vlgmr.msra.gmra.mxu1 %v113_v23 }
 0x196   :  { %v201_v25 = vpop.f32.mrf.mxu1 }
 0x197   :  { %v202_v26 = vadd.f32 %v223_v24, %v201_v25 }
 0x198   :  { %v282_v27 = vpop.f32.mrf.mxu1 }
 0x199   :  { %205 = vmax.xlane.f32.xlu0 %v202_v26 }
 0x222   :  { %v206_v28 = vpop.xlane.xlu0 %205 }
 0x223   :  { %v207_v29 = vsub.f32 %v202_v26, %v206_v28 }
 0x225   :  { %v208_v30 = vmul.f32 1.442695, %v207_v29 }
 0x227   :  { %288 = vpow2.f32 %v208_v30 }
 0x234   :  { %v289_v31 = vpop.eup %288 }
 0x235   :  { %210 = vadd.xlane.f32.xlu0 %v289_v31 }
 0x2be   :  { %v211_v32 = vpop.xlane.xlu0 %210 }
 0x2bf   :  { %290 = vrcp.f32 %v211_v32 }
 0x2cc   :  { %v291_v33 = vpop.eup %290 }
 0x2cd   :  { %v213_v34 = vmul.f32 %v291_v33, %v289_v31 }
 0x2cf   :  { %214 = vst [vmem:[%s357_s3] sm:$0xff] %v213_v34 }
 0x2d0   :  { %219 = vsyncpa [#allocation3], 1 }

</bundles_post_ra>
